<compile_context>
chip_gen: v5e
topology: v5e:2x2
jax: 0.10.0
libtpu: 0.0.40
codegen_flags: <defaults>
</compile_context>

<pallas_src>
import jax
import jax.numpy as jnp
import numpy as np
from jax.experimental import pallas as pl
from jax.experimental.pallas import tpu as pltpu


def _round_up(x, m):
    return ((x + m - 1) // m) * m


def _upsample1d_kernel(x_ref, halo_ref, wx_ref, wp_ref, wn_ref, b_ref, out_ref):
    # x_ref   : (1, tl, Cp)    bf16  current token tile
    # halo_ref: (1, 1, 2, Cp)  bf16  [x[j0-1], x[j0+tl]] (zeros past sequence edges)
    # wx_ref  : (Cp, 2*Cp)     bf16  [W1 | W2]
    # wp_ref  : (Cp, Cp)       bf16  W3  (mixes x[j-1] into even outputs)
    # wn_ref  : (Cp, Cp)       bf16  W0  (mixes x[j+1] into odd outputs)
    # b_ref   : (1, Cp)        f32
    # out_ref : (1, tl, 2*Cp)        left half = out[2j], right half = out[2j+1]
    x = x_ref[0]                                   # (tl, Cp) bf16
    tl, cp = x.shape

    # Rebuild shifted token streams from the tile + 2-row halo (done in f32 so
    # the unaligned sublane slice/concat runs on the native 32-bit layout).
    x32 = x.astype(jnp.float32)
    halo32 = halo_ref[0, 0].astype(jnp.float32)    # (2, Cp)
    xp = jnp.concatenate([halo32[0:1, :], x32[: tl - 1, :]], axis=0)   # x[j-1]
    xn = jnp.concatenate([x32[1:, :], halo32[1:2, :]], axis=0)         # x[j+1]
    xp = xp.astype(jnp.bfloat16)
    xn = xn.astype(jnp.bfloat16)

    b = b_ref[...]                                                     # (1, Cp) f32
    z = jnp.dot(x, wx_ref[...], preferred_element_type=jnp.float32)    # (tl, 2*Cp)
    even = z[:, :cp] + jnp.dot(xp, wp_ref[...],
                               preferred_element_type=jnp.float32) + b
    odd = z[:, cp:] + jnp.dot(xn, wn_ref[...],
                              preferred_element_type=jnp.float32) + b

    out_ref[0, :, :cp] = even.astype(out_ref.dtype)
    out_ref[0, :, cp:] = odd.astype(out_ref.dtype)


def _pick_token_tile(L, Cp):
    """Largest multiple-of-8 token tile that fits a ~40 MiB VMEM budget."""
    budget = 40 * 1024 * 1024
    # resident weights ([W1|W2], W3, W0 in bf16), double-buffered by the pipeline
    weight_bytes = 2 * (4 * Cp * Cp) * 2
    # per token row, double-buffered: bf16 input tile + f32 (2*Cp)-wide output tile
    per_row = 2 * (Cp * 2) + 2 * (2 * Cp * 4)
    avail = max(budget - weight_bytes, 8 * per_row)
    tl = min(int(avail // per_row), 512)
    tl = max(8, (tl // 8) * 8)
    return min(tl, _round_up(L, 8))


@jax.jit
def upsample1d(x, weight, bias):
    """x: (N, C, L); weight: (C_in, C_out, 4) [PyTorch ConvTranspose1d layout];
    bias: (C_out,). Returns (N, C, 2L)."""
    N, C, L = x.shape
    out_dtype = x.dtype

    Cp = _round_up(C, 128)            # lane-dense channel count
    tl = _pick_token_tile(L, Cp)      # token-tile length (multiple of 8)
    Lp = _round_up(L, tl)
    n_tiles = Lp // tl

    # ---- glue: NCL -> token-major (N, Lp, Cp), bf16 (single fused XLA pass) ----
    xt = jnp.transpose(x, (0, 2, 1))                                   # (N, L, C)
    xt = jnp.pad(xt, ((0, 0), (0, Lp - L), (0, Cp - C)))
    x_tok = xt.astype(jnp.bfloat16)                                    # (N, Lp, Cp)

    # 2-row halo per tile: [x[i*tl - 1], x[i*tl + tl]], zeros past sequence edges.
    zero_row = jnp.zeros((N, 1, Cp), jnp.bfloat16)
    prev_rows = jnp.concatenate([zero_row, x_tok[:, tl - 1:Lp - 1:tl, :]], axis=1)
    next_rows = jnp.concatenate([x_tok[:, tl:Lp:tl, :], zero_row], axis=1)
    halo = jnp.stack([prev_rows, next_rows], axis=2)                   # (N, n_tiles, 2, Cp)

    # ---- weights: pad channels, split taps, fuse [W1 | W2], cast bf16 ----
    w = jnp.pad(weight.astype(jnp.float32), ((0, Cp - C), (0, Cp - C), (0, 0)))
    w0, w1, w2, w3 = w[:, :, 0], w[:, :, 1], w[:, :, 2], w[:, :, 3]
    wx = jnp.concatenate([w1, w2], axis=1).astype(jnp.bfloat16)        # (Cp, 2*Cp)
    wp = w3.astype(jnp.bfloat16)                                       # (Cp, Cp)
    wn = w0.astype(jnp.bfloat16)                                       # (Cp, Cp)
    b = jnp.pad(bias.astype(jnp.float32), (0, Cp - C)).reshape(1, Cp)

    out = pl.pallas_call(
        _upsample1d_kernel,
        out_shape=jax.ShapeDtypeStruct((N, Lp, 2 * Cp), out_dtype),
        grid_spec=pltpu.PrefetchScalarGridSpec(
            num_scalar_prefetch=0,
            grid=(N, n_tiles),
            in_specs=[
                pl.BlockSpec((1, tl, Cp), lambda n, i: (n, i, 0)),
                pl.BlockSpec((1, 1, 2, Cp), lambda n, i: (n, i, 0, 0)),
                pl.BlockSpec((Cp, 2 * Cp), lambda n, i: (0, 0)),
                pl.BlockSpec((Cp, Cp), lambda n, i: (0, 0)),
                pl.BlockSpec((Cp, Cp), lambda n, i: (0, 0)),
                pl.BlockSpec((1, Cp), lambda n, i: (0, 0)),
            ],
            out_specs=pl.BlockSpec((1, tl, 2 * Cp), lambda n, i: (n, i, 0)),
        ),
        compiler_params=pltpu.CompilerParams(
            dimension_semantics=("parallel", "parallel"),
            vmem_limit_bytes=64 * 1024 * 1024,
        ),
    )(x_tok, halo, wx, wp, wn, b)

    # (N, Lp, 2*Cp) -> (N, 2*Lp, Cp) is a bit-preserving reshape (interleave was
    # fused in the kernel); crop the L/C padding and return NCL.
    out = out.reshape(N, 2 * Lp, Cp)[:, :2 * L, :C]
    # TODO(synk): if callers can consume (N, 2L, C) directly, drop this transpose
    # (it is one full-output HBM round trip kept only for PyTorch NCL parity).
    return jnp.transpose(out, (0, 2, 1))


def _reference_conv_transpose1d(x, weight, bias):
    """Naive numpy ConvTranspose1d(stride=2, padding=1, K=4) reference."""
    x = np.asarray(x, dtype=np.float32)
    w = np.asarray(weight, dtype=np.float32)      # (Cin, Cout, K)
    b = np.asarray(bias, dtype=np.float32)
    N, Cin, L = x.shape
    Cout, K, stride, pad = w.shape[1], w.shape[2], 2, 1
    Lout = (L - 1) * stride - 2 * pad + K
    out = np.zeros((N, Cout, Lout), dtype=np.float32)
    for n in range(N):
        for i in range(L):
            for k in range(K):
                t = i * stride - pad + k
                if 0 <= t < Lout:
                    out[n, :, t] += x[n, :, i] @ w[:, :, k]
    out += b[None, :, None]
    return out


if __name__ == "__main__":
    key = jax.random.PRNGKey(0)
    k1, k2, k3 = jax.random.split(key, 3)

    N, C, L = 2, 4, 16  # batch, dim, length

    x = jax.random.normal(k1, (N, C, L), dtype=jnp.float32)

    # nn.ConvTranspose1d parameter shapes: weight (C_in, C_out, K), bias (C_out,)
    bound = 1.0 / np.sqrt(C * 4)
    weight = jax.random.uniform(k2, (C, C, 4), jnp.float32, -bound, bound)
    bias = jax.random.uniform(k3, (C,), jnp.float32, -bound, bound)

    out = upsample1d(x, weight, bias)
    out = jax.block_until_ready(out)
    assert out.shape == (N, C, 2 * L), out.shape

    # Reference on bf16-rounded activations/weights (the kernel feeds the MXU in
    # bf16 with f32 accumulation), f32 bias — should match tightly.
    x_q = np.asarray(x.astype(jnp.bfloat16).astype(jnp.float32))
    w_q = np.asarray(weight.astype(jnp.bfloat16).astype(jnp.float32))
    ref = _reference_conv_transpose1d(x_q, w_q, np.asarray(bias))
    np.testing.assert_allclose(np.asarray(out), ref, rtol=1e-4, atol=1e-4)

    # Loose sanity check against the exact f32 reference (bounds bf16 rounding).
    ref_f32 = _reference_conv_transpose1d(np.asarray(x), np.asarray(weight),
                                          np.asarray(bias))
    np.testing.assert_allclose(np.asarray(out), ref_f32, rtol=3e-2, atol=3e-2)

    print("KERNEL_OK")
</pallas_src>

<mosaic_0001>
module attributes {stable_mosaic.version = 11 : i64} {
  func.func @_upsample1d_kernel(%arg0: i32, %arg1: i32, %arg2: memref<1x16x128xbf16, #tpu.memory_space<vmem>>, %arg3: memref<1x1x2x128xbf16, #tpu.memory_space<vmem>>, %arg4: memref<128x256xbf16, #tpu.memory_space<vmem>>, %arg5: memref<128x128xbf16, #tpu.memory_space<vmem>>, %arg6: memref<128x128xbf16, #tpu.memory_space<vmem>>, %arg7: memref<1x128xf32, #tpu.memory_space<vmem>>, %arg8: memref<1x16x256xf32, #tpu.memory_space<vmem>>) attributes {dimension_semantics = [#tpu.dimension_semantics<parallel>, #tpu.dimension_semantics<parallel>], iteration_bounds = array<i64: 2, 1>, scalar_prefetch = 0 : i64, scratch_operands = 0 : i64, tpu.core_type = #tpu.core_type<tc>, window_params = [{transform_indices = @transform_0, window_bounds = array<i64: 1, 16, 128>}, {transform_indices = @transform_1, window_bounds = array<i64: 1, 1, 2, 128>}, {pipeline_mode = #tpu.pipeline_mode<synchronous>, transform_indices = @transform_2, window_bounds = array<i64: 128, 256>}, {pipeline_mode = #tpu.pipeline_mode<synchronous>, transform_indices = @transform_3, window_bounds = array<i64: 128, 128>}, {pipeline_mode = #tpu.pipeline_mode<synchronous>, transform_indices = @transform_4, window_bounds = array<i64: 128, 128>}, {pipeline_mode = #tpu.pipeline_mode<synchronous>, transform_indices = @transform_5, window_bounds = array<i64: 1, 128>}, {transform_indices = @transform_6, window_bounds = array<i64: 1, 16, 256>}]} {
    %c0 = arith.constant 0 : index
    %c0_0 = arith.constant 0 : index
    %c0_1 = arith.constant 0 : index
    %0 = vector.load %arg2[%c0, %c0_0, %c0_1] : memref<1x16x128xbf16, #tpu.memory_space<vmem>>, vector<1x16x128xbf16>
    %1 = vector.shape_cast %0 : vector<1x16x128xbf16> to vector<16x128xbf16>
    %2 = arith.extf %1 : vector<16x128xbf16> to vector<16x128xf32>
    %c0_2 = arith.constant 0 : index
    %c0_3 = arith.constant 0 : index
    %c0_4 = arith.constant 0 : index
    %c0_5 = arith.constant 0 : index
    %3 = vector.load %arg3[%c0_2, %c0_3, %c0_4, %c0_5] : memref<1x1x2x128xbf16, #tpu.memory_space<vmem>>, vector<1x1x2x128xbf16>
    %4 = vector.shape_cast %3 : vector<1x1x2x128xbf16> to vector<2x128xbf16>
    %5 = arith.extf %4 : vector<2x128xbf16> to vector<2x128xf32>
    %6 = vector.extract_strided_slice %5 {offsets = [0, 0], sizes = [1, 128], strides = [1, 1]} : vector<2x128xf32> to vector<1x128xf32>
    %7 = vector.extract_strided_slice %2 {offsets = [0, 0], sizes = [15, 128], strides = [1, 1]} : vector<16x128xf32> to vector<15x128xf32>
    %8 = tpu.concatenate %6, %7 in 0 : vector<1x128xf32>, vector<15x128xf32> -> vector<16x128xf32>
    %9 = vector.extract_strided_slice %2 {offsets = [1, 0], sizes = [15, 128], strides = [1, 1]} : vector<16x128xf32> to vector<15x128xf32>
    %10 = vector.extract_strided_slice %5 {offsets = [1, 0], sizes = [1, 128], strides = [1, 1]} : vector<2x128xf32> to vector<1x128xf32>
    %11 = tpu.concatenate %9, %10 in 0 : vector<15x128xf32>, vector<1x128xf32> -> vector<16x128xf32>
    %12 = arith.truncf %8 : vector<16x128xf32> to vector<16x128xbf16>
    %13 = arith.truncf %11 : vector<16x128xf32> to vector<16x128xbf16>
    %c0_6 = arith.constant 0 : index
    %c0_7 = arith.constant 0 : index
    %14 = vector.load %arg7[%c0_6, %c0_7] : memref<1x128xf32, #tpu.memory_space<vmem>>, vector<1x128xf32>
    %c0_8 = arith.constant 0 : index
    %c0_9 = arith.constant 0 : index
    %15 = vector.load %arg4[%c0_8, %c0_9] : memref<128x256xbf16, #tpu.memory_space<vmem>>, vector<128x256xbf16>
    %cst = arith.constant dense<0.000000e+00> : vector<16x256xf32>
    %16 = tpu.matmul %1, %15, %cst {dimension_numbers = #tpu.dot_dimension_numbers<[1], [0], [0], [1], [0, 0, 1, 1], [], []>} : vector<16x128xbf16>, vector<128x256xbf16>, vector<16x256xf32> -> vector<16x256xf32>
    %17 = vector.extract_strided_slice %16 {offsets = [0, 0], sizes = [16, 128], strides = [1, 1]} : vector<16x256xf32> to vector<16x128xf32>
    %c0_10 = arith.constant 0 : index
    %c0_11 = arith.constant 0 : index
    %18 = vector.load %arg5[%c0_10, %c0_11] : memref<128x128xbf16, #tpu.memory_space<vmem>>, vector<128x128xbf16>
    %cst_12 = arith.constant dense<0.000000e+00> : vector<16x128xf32>
    %19 = tpu.matmul %12, %18, %cst_12 {dimension_numbers = #tpu.dot_dimension_numbers<[1], [0], [0], [1], [0, 0, 1, 1], [], []>} : vector<16x128xbf16>, vector<128x128xbf16>, vector<16x128xf32> -> vector<16x128xf32>
    %20 = arith.addf %17, %19 : vector<16x128xf32>
    %21 = vector.broadcast %14 : vector<1x128xf32> to vector<16x128xf32>
    %22 = arith.addf %20, %21 : vector<16x128xf32>
    %23 = vector.extract_strided_slice %16 {offsets = [0, 128], sizes = [16, 128], strides = [1, 1]} : vector<16x256xf32> to vector<16x128xf32>
    %c0_13 = arith.constant 0 : index
    %c0_14 = arith.constant 0 : index
    %24 = vector.load %arg6[%c0_13, %c0_14] : memref<128x128xbf16, #tpu.memory_space<vmem>>, vector<128x128xbf16>
    %cst_15 = arith.constant dense<0.000000e+00> : vector<16x128xf32>
    %25 = tpu.matmul %13, %24, %cst_15 {dimension_numbers = #tpu.dot_dimension_numbers<[1], [0], [0], [1], [0, 0, 1, 1], [], []>} : vector<16x128xbf16>, vector<128x128xbf16>, vector<16x128xf32> -> vector<16x128xf32>
    %26 = arith.addf %23, %25 : vector<16x128xf32>
    %27 = vector.broadcast %14 : vector<1x128xf32> to vector<16x128xf32>
    %28 = arith.addf %26, %27 : vector<16x128xf32>
    %c0_16 = arith.constant 0 : index
    %c0_17 = arith.constant 0 : index
    %c0_18 = arith.constant 0 : index
    %29 = vector.load %arg8[%c0_16, %c0_17, %c0_18] : memref<1x16x256xf32, #tpu.memory_space<vmem>>, vector<1x16x128xf32>
    %30 = vector.shape_cast %29 : vector<1x16x128xf32> to vector<16x128xf32>
    %31 = vector.shape_cast %22 : vector<16x128xf32> to vector<1x16x128xf32>
    tpu.vector_store %arg8[%c0_16, %c0_17, %c0_18], %31 {strides = array<i32>} : memref<1x16x256xf32, #tpu.memory_space<vmem>>, vector<1x16x128xf32>,
    %c0_19 = arith.constant 0 : index
    %c0_20 = arith.constant 0 : index
    %c128 = arith.constant 128 : index
    %32 = vector.load %arg8[%c0_19, %c0_20, %c128] : memref<1x16x256xf32, #tpu.memory_space<vmem>>, vector<1x16x128xf32>
    %33 = vector.shape_cast %32 : vector<1x16x128xf32> to vector<16x128xf32>
    %34 = vector.shape_cast %28 : vector<16x128xf32> to vector<1x16x128xf32>
    tpu.vector_store %arg8[%c0_19, %c0_20, %c128], %34 {strides = array<i32>} : memref<1x16x256xf32, #tpu.memory_space<vmem>>, vector<1x16x128xf32>,
    return
  }
  func.func @transform_0(%arg0: i32, %arg1: i32) -> (i32, i32, i32) {
    %c0_i32 = arith.constant 0 : i32
    %c0_i32_0 = arith.constant 0 : i32
    return %arg0, %arg1, %c0_i32 : i32, i32, i32
  }
  func.func @transform_1(%arg0: i32, %arg1: i32) -> (i32, i32, i32, i32) {
    %c0_i32 = arith.constant 0 : i32
    %c0_i32_0 = arith.constant 0 : i32
    %c0_i32_1 = arith.constant 0 : i32
    return %arg0, %arg1, %c0_i32, %c0_i32_0 : i32, i32, i32, i32
  }
  func.func @transform_2(%arg0: i32, %arg1: i32) -> (i32, i32) {
    %c0_i32 = arith.constant 0 : i32
    %c0_i32_0 = arith.constant 0 : i32
    %c0_i32_1 = arith.constant 0 : i32
    return %c0_i32, %c0_i32_0 : i32, i32
  }
  func.func @transform_3(%arg0: i32, %arg1: i32) -> (i32, i32) {
    %c0_i32 = arith.constant 0 : i32
    %c0_i32_0 = arith.constant 0 : i32
    %c0_i32_1 = arith.constant 0 : i32
    return %c0_i32, %c0_i32_0 : i32, i32
  }
  func.func @transform_4(%arg0: i32, %arg1: i32) -> (i32, i32) {
    %c0_i32 = arith.constant 0 : i32
    %c0_i32_0 = arith.constant 0 : i32
    %c0_i32_1 = arith.constant 0 : i32
    return %c0_i32, %c0_i32_0 : i32, i32
  }
  func.func @transform_5(%arg0: i32, %arg1: i32) -> (i32, i32) {
    %c0_i32 = arith.constant 0 : i32
    %c0_i32_0 = arith.constant 0 : i32
    %c0_i32_1 = arith.constant 0 : i32
    return %c0_i32, %c0_i32_0 : i32, i32
  }
  func.func @transform_6(%arg0: i32, %arg1: i32) -> (i32, i32, i32) {
    %c0_i32 = arith.constant 0 : i32
    %c0_i32_0 = arith.constant 0 : i32
    return %arg0, %arg1, %c0_i32 : i32, i32, i32
  }
}

</mosaic_0001>

<bundles_post_ra>
// kernel: upsample1d.1
= control target key start
LH: loop header
LB: loop body
LE: loop exit
PB: predicated region body
PF: predicated region fallthrough
CT: control target
= control target key end

     0   :  { %s1014_s21 = smov 0   ;;  %s1016_s22 = smov 0   ;;  %s1214_s0 = inlined_call_operand.vmem [shape: bf16[2,16,128], index: 0, kind: input, shape index: {}]   ;;  %s1215_s1 = inlined_call_operand.vmem [shape: bf16[2,1,2,128], index: 1, kind: input, shape index: {}]   ;;  %s1216_s2 = inlined_call_operand.vmem [shape: bf16[128,256], index: 2, kind: input, shape index: {}]   ;;  %s1217_s3 = inlined_call_operand.vmem [shape: bf16[128,128], index: 3, kind: input, shape index: {}]   ;;  %s1218_s4 = inlined_call_operand.vmem [shape: bf16[128,128], index: 4, kind: input, shape index: {}]   ;;  %s1219_s5 = inlined_call_operand.vmem [shape: f32[1,128], index: 5, kind: input, shape index: {}]   ;;  %s1220_s6 = inlined_call_operand.vmem [shape: f32[2,16,256], index: 6, kind: output, shape index: {}]  }
   0x1   :  { %s1018_s23 = smov 0  }
   0x2 LB: > { %s28_s24 = sadd.s32 1, %s973_s22  ;;  %p756_p0 = scmp.ge.s32.totalorder %s977_s23, 1  ;;  %s977_s23 = sphi %s1018_s23, %s16_s23   ;;  %s973_s22 = sphi %s1016_s22, %s1222_s22   ;;  %s969_s21 = sphi %s1014_s21, %s1221_s21  }
   0x3   : > { %p30_p1 = scmp.ge.s32.totalorder %s28_s24, 2  ;;  %p246_p2 = scmp.lt.s32.totalorder %s977_s23, 3 }
   0x5   : > { %s1224_s24 = smov (%p30_p1, %s28_s24), 0  ;;  %p247_p3 = pnand %p756_p0, %p246_p2 }
   0x6   : > { %p292_p4 = scmp.lt.s32.totalorder (!%p247_p3), %s969_s21, 1 }
   0x7   : > { %250 = sbr.rel (%p247_p3) target bundleno = 192 (0xc0), region = 44 }
   0xc   : > { %v823_v0 = vld [vmem:[%s1216_s2 + $0x70] sm:$0xf]  ;;  %v913_v1 = vld [vmem:[%s1216_s2 + $0x74] sm:$0xf0]  ;;  %v912_v2 = vld [vmem:[%s1216_s2 + $0x74] sm:$0xf] }
   0xd   : > { %v824_v3 = vor.u32 %v913_v1, %v823_v0  ;;  %v825_v4 = vld [vmem:[%s1216_s2 + $0x78] sm:$0xf0]  ;;  %v815_v8 = vld [vmem:[%s1216_s2 + $0x60] sm:$0xf]  ;;  %v911_v9 = vld [vmem:[%s1216_s2 + $0x64] sm:$0xf0] }
   0xe   : > { %v921_v5 = vld [vmem:[%s1217_s3 + $0x38] sm:$0xff]  ;;  %v828_v7 = vor.u32 %v912_v2, %v825_v4  ;;  %v910_v10 = vld [vmem:[%s1216_s2 + $0x64] sm:$0xf]  ;;  %v816_v11 = vor.u32 %v911_v9, %v815_v8  ;;  %v817_v12 = vld [vmem:[%s1216_s2 + $0x68] sm:$0xf0]  ;;  %s1226_s21 = smov (!%p292_p4, %s969_s21), 1 }
   0xf   : > { %v929_v6 = vld [vmem:[%s1218_s4 + $0x38] sm:$0xff]  ;;  %448 = vmatpush.bf16.msra.mxu0 %v824_v3  ;;  %540 = vmatpush.bf16.msra.mxu2 %v921_v5  ;;  %v920_v13 = vld [vmem:[%s1217_s3 + $0x30] sm:$0xff]  ;;  %v820_v14 = vor.u32 %v910_v10, %v817_v12  ;;  %v919_v21 = vld [vmem:[%s1217_s3 + $0x28] sm:$0xff]  ;;  %s895_s29 = sshll.u32 %s1226_s21, 3  ;;  %s306_s27 = scalar_lea.vmem %s1215_s1, %s1226_s21  ;;  %vm326_vm0 = vcmask 1040384   ;;  %vm333_vm1 = vcmask 1046528  }
  0x10   : > { %462 = vmatpush.bf16.msra.mxu1 %v828_v7  ;;  %625 = vmatpush.bf16.msra.mxu3 %v929_v6  ;;  %v928_v15 = vld [vmem:[%s1218_s4 + $0x30] sm:$0xff]  ;;  %v909_v17 = vld [vmem:[%s1216_s2 + $0x54] sm:$0xf0]  ;;  %v809_v19 = vld [vmem:[%s1216_s2 + $0x58] sm:$0xf0]  ;;  %s1128_s20 = scalar_lea.vmem %s1214_s0, %s895_s29  ;;  %s896_s7 = sshll.u32 %s1226_s21, 5 }
  0x11   : > { %v807_v16 = vld [vmem:[%s1216_s2 + $0x50] sm:$0xf]  ;;  %v908_v18 = vld [vmem:[%s1216_s2 + $0x54] sm:$0xf]  ;;  %v927_v23 = vld [vmem:[%s1218_s4 + $0x28] sm:$0xff]  ;;  %s316_s29 = scalar_lea.vmem %s1220_s6, %s896_s7 }
  0x12   : > { %v808_v20 = vor.u32 %v909_v17, %v807_v16  ;;  %v812_v22 = vor.u32 %v908_v18, %v809_v19  ;;  %v799_v24 = vld [vmem:[%s1216_s2 + $0x40] sm:$0xf]  ;;  %v907_v25 = vld [vmem:[%s1216_s2 + $0x44] sm:$0xf0]  ;;  %v906_v26 = vld [vmem:[%s1216_s2 + $0x44] sm:$0xf] }
  0x13   : > { %449 = vmatpush.bf16.msra.mxu0 %v816_v11  ;;  %541 = vmatpush.bf16.msra.mxu2 %v920_v13  ;;  %v801_v27 = vld [vmem:[%s1216_s2 + $0x48] sm:$0xf0]  ;;  %v800_v28 = vor.u32 %v907_v25, %v799_v24  ;;  %v918_v29 = vld [vmem:[%s1217_s3 + $0x20] sm:$0xff]  ;;  %v791_v32 = vld [vmem:[%s1216_s2 + $0x30] sm:$0xf] }
  0x14   : > { %463 = vmatpush.bf16.msra.mxu1 %v820_v14  ;;  %626 = vmatpush.bf16.msra.mxu3 %v928_v15  ;;  %v804_v30 = vor.u32 %v906_v26, %v801_v27  ;;  %v926_v31 = vld [vmem:[%s1218_s4 + $0x20] sm:$0xff]  ;;  %v905_v33 = vld [vmem:[%s1216_s2 + $0x34] sm:$0xf0]  ;;  %v904_v34 = vld [vmem:[%s1216_s2 + $0x34] sm:$0xf] }
  0x15   : > { %v793_v35 = vld [vmem:[%s1216_s2 + $0x38] sm:$0xf0]  ;;  %v792_v36 = vor.u32 %v905_v33, %v791_v32  ;;  %v783_v39 = vld [vmem:[%s1216_s2 + $0x20] sm:$0xf]  ;;  %v903_v41 = vld [vmem:[%s1216_s2 + $0x24] sm:$0xf0] }
  0x16   : > { %v917_v37 = vld [vmem:[%s1217_s3 + $0x18] sm:$0xff]  ;;  %v796_v40 = vor.u32 %v904_v34, %v793_v35  ;;  %v902_v42 = vld [vmem:[%s1216_s2 + $0x24] sm:$0xf]  ;;  %v785_v44 = vld [vmem:[%s1216_s2 + $0x28] sm:$0xf0]  ;;  %v784_v46 = vor.u32 %v903_v41, %v783_v39 }
  0x17   : > { %450 = vmatpush.bf16.msra.mxu0 %v808_v20  ;;  %542 = vmatpush.bf16.msra.mxu2 %v919_v21  ;;  %v925_v38 = vld [vmem:[%s1218_s4 + $0x18] sm:$0xff]  ;;  %v318_v43 = vld [vmem:[%s1128_s20] sm:$0xff]   ;;  %v916_v47 = vld [vmem:[%s1217_s3 + $0x10] sm:$0xff]  ;;  %v788_v50 = vor.u32 %v902_v42, %v785_v44 }
  0x18   : > { %464 = vmatpush.bf16.msra.mxu1 %v812_v22  ;;  %627 = vmatpush.bf16.msra.mxu3 %v927_v23  ;;  %v322_v45 = vld [vmem:[%s306_s27] sm:$0x1]  ;;  %v320_v48 = vunpack.c.l.bf16 %v318_v43  ;;  %v321_v49 = vunpack.c.h.bf16 %v318_v43  ;;  %v924_v51 = vld [vmem:[%s1218_s4 + $0x10] sm:$0xff]  ;;  %v901_v53 = vld [vmem:[%s1216_s2 + $0x14] sm:$0xf0] }
  0x19   : > { %v775_v52 = vld [vmem:[%s1216_s2 + $0x10] sm:$0xf]  ;;  %v323_v54 = vunpack.c.l.bf16 %v322_v45  ;;  %v900_v55 = vld [vmem:[%s1216_s2 + $0x14] sm:$0xf]  ;;  %v777_v56 = vld [vmem:[%s1216_s2 + $0x18] sm:$0xf0] }
  0x1a   : > { %v776_v57 = vor.u32 %v901_v53, %v775_v52  ;;  %v915_v58 = vld [vmem:[%s1217_s3 + $0x8] sm:$0xff]  ;;  %v767_v59 = vld [vmem:[%s1216_s2] sm:$0xf]  ;;  %v327_v60 = vrot.slane %v320_v48, 7  ;;  %v328_v61 = vrot.slane %v321_v49, 7  ;;  %v780_v62 = vor.u32 %v900_v55, %v777_v56 }
  0x1b   : > { %451 = vmatpush.bf16.msra.mxu0 %v800_v28  ;;  %543 = vmatpush.bf16.msra.mxu2 %v918_v29  ;;  %v923_v63 = vld [vmem:[%s1218_s4 + $0x8] sm:$0xff]  ;;  %v334_v1 = vrot.slane %v320_v48, 1  ;;  %v335_v2 = vrot.slane %v321_v49, 1  ;;  %v340_v3 = vperm.slane %v323_v54, 1  ;;  %v898_v4 = vld [vmem:[%s1216_s2 + $0x4] sm:$0xf] }
  0x1c   : > { %465 = vmatpush.bf16.msra.mxu1 %v804_v30  ;;  %628 = vmatpush.bf16.msra.mxu3 %v926_v31  ;;  %v899_v0 = vld [vmem:[%s1216_s2 + $0x4] sm:$0xf0]  ;;  %v769_v5 = vld [vmem:[%s1216_s2 + $0x8] sm:$0xf0]  ;;  %v914_v7 = vld [vmem:[%s1217_s3] sm:$0xff]  ;;  %v329_v8 = vsel %vm326_vm0, %v327_v60, %v328_v61  ;;  %v332_v9 = vsel %vm326_vm0, %v323_v54, %v327_v60 }
  0x1d   : > { %v768_v6 = vor.u32 %v899_v0, %v767_v59  ;;  %v772_v10 = vor.u32 %v898_v4, %v769_v5  ;;  %v922_v11 = vld [vmem:[%s1218_s4] sm:$0xff]  ;;  %v336_v12 = vsel %vm333_vm1, %v334_v1, %v335_v2  ;;  %v342_v13 = vsel %vm333_vm1, %v335_v2, %v340_v3 }
  0x1e   : > { %v897_v14 = vld [vmem:[%s1128_s20] sm:$0xff]  ;;  %v343_v15 = vpack.c.bf16 %v329_v8, %v332_v9  ;;  %v344_v16 = vpack.c.bf16 %v342_v13, %v336_v12 }
  0x1f   : > { %452 = vmatpush.bf16.msra.mxu0 %v792_v36  ;;  %544 = vmatpush.bf16.msra.mxu2 %v917_v37  ;;  %v954_v19 = vld [vmem:[%s1219_s5] ss:$0 sm:$0xff] }
  0x20   : > { %466 = vmatpush.bf16.msra.mxu1 %v796_v40  ;;  %629 = vmatpush.bf16.msra.mxu3 %v925_v38 }
  0x23   : > { %453 = vmatpush.bf16.msra.mxu0 %v784_v46  ;;  %545 = vmatpush.bf16.msra.mxu2 %v916_v47 }
  0x24   : > { %467 = vmatpush.bf16.msra.mxu1 %v788_v50  ;;  %630 = vmatpush.bf16.msra.mxu3 %v924_v51 }
  0x27   : > { %454 = vmatpush.bf16.msra.mxu0 %v776_v57  ;;  %546 = vmatpush.bf16.msra.mxu2 %v915_v58 }
  0x28   : > { %468 = vmatpush.bf16.msra.mxu1 %v780_v62  ;;  %631 = vmatpush.bf16.msra.mxu3 %v923_v63 }
  0x2b   : > { %455 = vmatpush.bf16.msra.mxu0 %v768_v6  ;;  %547 = vmatpush.bf16.msra.mxu2 %v914_v7 }
  0x2c   : > { %469 = vmatpush.bf16.msra.mxu1 %v772_v10  ;;  %632 = vmatpush.bf16.msra.mxu3 %v922_v11 }
  0x2e   : > { %456 = vmatmul.bf16.vlgmr.msra.gmra.mxu0 %v897_v14  ;;  %548 = vmatmul.bf16.vlgmr.msra.gmra.mxu2 %v343_v15 }
  0x2f   : > { %470 = vmatmul.bf16.vlgmr.msra.gmra.mxu1 %v897_v14  ;;  %633 = vmatmul.bf16.vlgmr.msra.gmra.mxu3 %v344_v16 }
  0xab   : > { %v457_v17 = vpop.f32.mrf.mxu0 }
  0xac   : > { %v471_v18 = vpop.f32.mrf.mxu1 }
  0xb1   : > { %v549_v20 = vpop.f32.mrf.mxu2 }
  0xb2   : > { %v554_v21 = vadd.f32 %v549_v20, %v457_v17  ;;  %v634_v22 = vpop.f32.mrf.mxu3 }
  0xb3   : > { %v639_v23 = vadd.f32 %v634_v22, %v471_v18  ;;  %v459_v26 = vpop.f32.mrf.mxu0 }
  0xb4   : > { %v559_v24 = vadd.f32 %v954_v19, %v554_v21  ;;  %v473_v28 = vpop.f32.mrf.mxu1 }
  0xb5   : > { %v641_v25 = vadd.f32 %v954_v19, %v639_v23 }
  0xb6   : > { %643 = vst [vmem:[%s316_s29] sm:$0xff] %v559_v24 }
  0xb7   : > { %645 = vst [vmem:[%s316_s29 + $0x8] sm:$0xff] %v641_v25 }
  0xb9   : > { %v551_v27 = vpop.f32.mrf.mxu2 }
  0xba   : > { %v555_v29 = vadd.f32 %v551_v27, %v459_v26  ;;  %v636_v30 = vpop.f32.mrf.mxu3 }
  0xbb   : > { %v640_v31 = vadd.f32 %v636_v30, %v473_v28 }
  0xbc   : > { %v560_v32 = vadd.f32 %v954_v19, %v555_v29 }
  0xbd   : > { %v642_v33 = vadd.f32 %v954_v19, %v640_v31 }
  0xbe   : > { %644 = vst [vmem:[%s316_s29 + $0x10] sm:$0xff] %v560_v32 }
  0xbf   : > { %646 = vst [vmem:[%s316_s29 + $0x18] sm:$0xff] %v642_v33 }
  0xc0 PF: > { %s16_s23 = sadd.s32 1, %s977_s23   ;;  %s1221_s21 = smov %s973_s22 }
  0xc1   : > { %p13_p5 = scmp.ge.s32.totalorder %s16_s23, 4   ;;  %s1222_s22 = smov %s1224_s24 }
  0xc3   :  { %15 = sbr.rel (!%p13_p5) target bundleno = 2 (0x2), region = 77 }

</bundles_post_ra>
